<compile_context>
chip_gen: v7x
topology: tpu7x:2x2x1
jax: 0.10.0
libtpu: 0.0.40
codegen_flags: <defaults>
</compile_context>

<pallas_src>
import functools

import numpy as np
import jax
import jax.numpy as jnp
from jax import lax
from jax.experimental import pallas as pl
from jax.experimental.pallas import tpu as pltpu

_LANE = 128
_SUBLANE = 8
_TB_CAP = 128     # batch rows per grid step
_TK_CAP = 8192    # lane tile: 2 inputs x 2 bufs x 128x8192 f32 = 16 MiB VMEM


def _round_up(x, m):
    return (x + m - 1) // m * m


def _cdiv(a, b):
    return -(-a // b)


def _tloss_numerator_kernel(x_ref, y_ref, w_ref, out_ref, acc_ref, *,
                            tk, grid_k, n_valid, need_mask):
    """Accumulate per-sample, per-lane partial sums of (x - y)^2 * w."""
    s = pl.program_id(0)          # spatial split (parallel; feeds both v7x TCs)
    k = pl.program_id(2)          # reduction step (innermost, arbitrary)

    @pl.when(k == 0)
    def _():
        acc_ref[...] = jnp.zeros_like(acc_ref)

    tb = x_ref.shape[0]
    g = tk // _LANE
    if need_mask:
        lane_iota = lax.broadcasted_iota(jnp.int32, (tb, _LANE), 1)
        col0 = (s * grid_k + k) * tk

    # Fold TK lanes down to 128 lanes with pure VPU adds over 128-lane chunks.
    # Each chunk is only ~TB/8 * 1 vregs per operand -> tiny live ranges.
    partial = jnp.zeros((tb, _LANE), jnp.float32)
    for j in range(g):
        sl = slice(j * _LANE, (j + 1) * _LANE)
        d = x_ref[:, sl].astype(jnp.float32) - y_ref[:, sl].astype(jnp.float32)
        p = d * d * w_ref[:, sl]
        if need_mask:
            col = col0 + (j * _LANE) + lane_iota
            p = jnp.where(col < n_valid, p, 0.0)
        partial = partial + p
    acc_ref[...] += partial

    @pl.when(k == pl.num_programs(2) - 1)
    def _():
        out_ref[0, :, :] = acc_ref[...]


def tloss_numerator(input_t, target_t, lambdas, epsilon):
    """Per-sample sum_{w,h} (input - target)^2 * exp(lambdas + eps) via Pallas."""
    B, W, H = input_t.shape
    N = W * H

    x = input_t.reshape(B, N)
    y = target_t.reshape(B, N)
    # exp(lambdas + eps) computed once here (N elements, negligible HBM).
    w = jnp.exp(lambdas.reshape(1, N).astype(jnp.float32) + jnp.float32(epsilon))

    TB = min(_round_up(B, _SUBLANE), _TB_CAP)
    TK = min(_round_up(N, _LANE), _TK_CAP)

    grid_b = _cdiv(B, TB)
    total_k = _cdiv(N, TK)
    # Give v7x's second TensorCore work when the batch axis has a single tile.
    n_split = 2 if (grid_b == 1 and total_k >= 2) else 1
    grid_k = _cdiv(total_k, n_split)

    pad_n = n_split * grid_k * TK
    need_mask = pad_n != N
    if pad_n != N:
        # Only the tiny weight array is padded (zeros); x/y stay unpadded.
        w = jnp.pad(w, ((0, 0), (0, pad_n - N)))

    last_k_block = total_k - 1

    def xy_map(s, b, k):
        # Clamp over-split block indices; those columns are zero-masked in-kernel.
        return (b, jnp.minimum(s * grid_k + k, last_k_block))

    def w_map(s, b, k):
        return (0, s * grid_k + k)

    def out_map(s, b, k):
        return (s, b, 0)

    in_bytes = int(x.size) * x.dtype.itemsize + int(y.size) * y.dtype.itemsize
    cost = pl.CostEstimate(
        flops=4 * B * N,
        transcendentals=0,
        bytes_accessed=in_bytes + int(w.size) * 4 + n_split * B * _LANE * 4,
    )

    # 2 inputs x 2 buffers x (TB, TK) f32 plus headroom for spills/scratch.
    vmem_limit = int(min(max(2 * 2 * TB * TK * 4 + (24 << 20), 32 << 20),
                         112 << 20))

    out = pl.pallas_call(
        functools.partial(_tloss_numerator_kernel, tk=TK, grid_k=grid_k,
                          n_valid=N, need_mask=need_mask),
        out_shape=jax.ShapeDtypeStruct((n_split, B, _LANE), jnp.float32),
        grid_spec=pltpu.PrefetchScalarGridSpec(
            num_scalar_prefetch=0,
            grid=(n_split, grid_b, grid_k),
            in_specs=[
                pl.BlockSpec((TB, TK), xy_map),
                pl.BlockSpec((TB, TK), xy_map),
                pl.BlockSpec((1, TK), w_map),
            ],
            out_specs=pl.BlockSpec((1, TB, _LANE), out_map),
            scratch_shapes=[pltpu.VMEM((TB, _LANE), jnp.float32)],
        ),
        compiler_params=pltpu.CompilerParams(
            dimension_semantics=("parallel", "parallel", "arbitrary"),
            vmem_limit_bytes=vmem_limit,
        ),
        cost_estimate=cost,
    )(x, y, w)

    # (n_split, B, 128) lane-dense partials -> per-sample numerator (B,).
    return jnp.sum(out, axis=(0, 2))


def tloss_forward(input_t, target_t, nu, lambdas, epsilon=1e-8, reduction="mean"):
    """Matches TLoss.forward semantics exactly (float32)."""
    B, W, H = input_t.shape
    D = jnp.float32(W * H)
    eps = jnp.float32(epsilon)

    # Hot path: per-sample weighted squared-error reduction (Pallas kernel).
    numerator = tloss_numerator(input_t, target_t, lambdas, epsilon)   # (B,)

    # Scalar glue terms (cheap, plain JAX).
    sum_nu_epsilon = jnp.exp(nu) + eps
    first_term = -lax.lgamma((sum_nu_epsilon + D) / 2.0)
    second_term = lax.lgamma(sum_nu_epsilon / 2.0)
    third_term = -0.5 * jnp.sum(lambdas + eps)
    fourth_term = D / 2.0 * jnp.log(jnp.float32(np.pi))
    fifth_term = D / 2.0 * (nu + eps)

    fraction = numerator / sum_nu_epsilon
    sixth_term = (sum_nu_epsilon + D) / 2.0 * jnp.log(1.0 + fraction)

    total_losses = (first_term + second_term + third_term
                    + fourth_term + fifth_term + sixth_term)   # (B,)

    if reduction == "mean":
        return total_losses.mean()
    elif reduction == "sum":
        return total_losses.sum()
    elif reduction == "none":
        return total_losses
    else:
        raise ValueError(f"The reduction method '{reduction}' is not implemented.")


def _reference(input_t, target_t, nu, lambdas, epsilon=1e-8):
    # Pure-JAX reference of the PyTorch forward for a correctness check.
    B, W, H = input_t.shape
    D = jnp.float32(W * H)
    eps = jnp.float32(epsilon)
    delta = input_t.astype(jnp.float32) - target_t.astype(jnp.float32)
    sum_nu_epsilon = jnp.exp(nu) + eps
    first = -lax.lgamma((sum_nu_epsilon + D) / 2.0)
    second = lax.lgamma(sum_nu_epsilon / 2.0)
    third = -0.5 * jnp.sum(lambdas + eps)
    fourth = D / 2.0 * jnp.log(jnp.float32(np.pi))
    fifth = D / 2.0 * (nu + eps)
    num = jnp.sum(delta * delta * jnp.exp(lambdas + eps), axis=(1, 2))
    sixth = (sum_nu_epsilon + D) / 2.0 * jnp.log(1.0 + num / sum_nu_epsilon)
    return (first + second + third + fourth + fifth + sixth).mean()


if __name__ == "__main__":
    # Config implied by the module: image_size x image_size spatial, batch B.
    B, IMG = 2, 16
    key = jax.random.PRNGKey(0)
    k1, k2 = jax.random.split(key)
    input_t = jax.random.normal(k1, (B, IMG, IMG), dtype=jnp.float32)
    target_t = jax.random.normal(k2, (B, IMG, IMG), dtype=jnp.float32)

    # Deterministic parameter init (matches TLoss.__init__ shapes/values).
    nu = jnp.float32(1.0)                                 # nn.Parameter scalar
    lambdas = jnp.ones((IMG, IMG), dtype=jnp.float32)     # buffer of ones
    epsilon = 1e-8

    loss_fn = jax.jit(functools.partial(tloss_forward, epsilon=epsilon,
                                        reduction="mean"))
    loss = jax.block_until_ready(loss_fn(input_t, target_t, nu, lambdas))

    ref = jax.block_until_ready(_reference(input_t, target_t, nu, lambdas, epsilon))
    assert jnp.allclose(loss, ref, rtol=1e-5, atol=1e-5), (loss, ref)

    print("KERNEL_OK")
</pallas_src>

<mosaic_0001>
module attributes {stable_mosaic.version = 11 : i64} {
  func.func @_tloss_numerator_kernel(%arg0: i32, %arg1: i32, %arg2: i32, %arg3: memref<8x256xf32, #tpu.memory_space<vmem>>, %arg4: memref<8x256xf32, #tpu.memory_space<vmem>>, %arg5: memref<1x256xf32, #tpu.memory_space<vmem>>, %arg6: memref<1x8x128xf32, #tpu.memory_space<vmem>>, %arg7: memref<8x128xf32, #tpu.memory_space<vmem>>) attributes {dimension_semantics = [#tpu.dimension_semantics<parallel>, #tpu.dimension_semantics<parallel>, #tpu.dimension_semantics<arbitrary>], iteration_bounds = array<i64: 1, 1, 1>, scalar_prefetch = 0 : i64, scratch_operands = 1 : i64, tpu.core_type = #tpu.core_type<tc>, window_params = [{transform_indices = @transform_0, window_bounds = array<i64: 8, 256>}, {transform_indices = @transform_1, window_bounds = array<i64: 8, 256>}, {transform_indices = @transform_2, window_bounds = array<i64: 1, 256>}, {transform_indices = @transform_3, window_bounds = array<i64: 1, 8, 128>}]} {
    %c0_i32 = arith.constant 0 : i32
    %0 = arith.cmpi eq, %arg2, %c0_i32 : i32
    %1 = arith.extui %0 : i1 to i32
    %c0_i32_0 = arith.constant 0 : i32
    %2 = arith.cmpi ne, %1, %c0_i32_0 : i32
    scf.if %2 {
      %cst_17 = arith.constant 0.000000e+00 : f32
      %26 = vector.broadcast %cst_17 : f32 to vector<8x128xf32>
      %c0_18 = arith.constant 0 : index
      %c0_19 = arith.constant 0 : index
      %27 = vector.load %arg7[%c0_18, %c0_19] : memref<8x128xf32, #tpu.memory_space<vmem>>, vector<8x128xf32>
      tpu.vector_store %arg7[%c0_18, %c0_19], %26 {strides = array<i32>} : memref<8x128xf32, #tpu.memory_space<vmem>>, vector<8x128xf32>,
    } else {
    }
    %cst = arith.constant 0.000000e+00 : f32
    %3 = vector.broadcast %cst : f32 to vector<8x128xf32>
    %c0 = arith.constant 0 : index
    %c0_1 = arith.constant 0 : index
    %4 = vector.load %arg3[%c0, %c0_1] : memref<8x256xf32, #tpu.memory_space<vmem>>, vector<8x128xf32>
    %c0_2 = arith.constant 0 : index
    %c0_3 = arith.constant 0 : index
    %5 = vector.load %arg4[%c0_2, %c0_3] : memref<8x256xf32, #tpu.memory_space<vmem>>, vector<8x128xf32>
    %6 = arith.subf %4, %5 : vector<8x128xf32>
    %7 = arith.mulf %6, %6 : vector<8x128xf32>
    %c0_4 = arith.constant 0 : index
    %c0_5 = arith.constant 0 : index
    %8 = vector.load %arg5[%c0_4, %c0_5] : memref<1x256xf32, #tpu.memory_space<vmem>>, vector<1x128xf32>
    %9 = vector.broadcast %8 : vector<1x128xf32> to vector<8x128xf32>
    %10 = arith.mulf %7, %9 : vector<8x128xf32>
    %11 = arith.addf %3, %10 : vector<8x128xf32>
    %c0_6 = arith.constant 0 : index
    %c128 = arith.constant 128 : index
    %12 = vector.load %arg3[%c0_6, %c128] : memref<8x256xf32, #tpu.memory_space<vmem>>, vector<8x128xf32>
    %c0_7 = arith.constant 0 : index
    %c128_8 = arith.constant 128 : index
    %13 = vector.load %arg4[%c0_7, %c128_8] : memref<8x256xf32, #tpu.memory_space<vmem>>, vector<8x128xf32>
    %14 = arith.subf %12, %13 : vector<8x128xf32>
    %15 = arith.mulf %14, %14 : vector<8x128xf32>
    %c0_9 = arith.constant 0 : index
    %c128_10 = arith.constant 128 : index
    %16 = vector.load %arg5[%c0_9, %c128_10] : memref<1x256xf32, #tpu.memory_space<vmem>>, vector<1x128xf32>
    %17 = vector.broadcast %16 : vector<1x128xf32> to vector<8x128xf32>
    %18 = arith.mulf %15, %17 : vector<8x128xf32>
    %19 = arith.addf %11, %18 : vector<8x128xf32>
    %c0_11 = arith.constant 0 : index
    %c0_12 = arith.constant 0 : index
    %20 = vector.load %arg7[%c0_11, %c0_12] : memref<8x128xf32, #tpu.memory_space<vmem>>, vector<8x128xf32>
    %21 = arith.addf %20, %19 : vector<8x128xf32>
    %c0_13 = arith.constant 0 : index
    %c0_14 = arith.constant 0 : index
    %22 = vector.load %arg7[%c0_13, %c0_14] : memref<8x128xf32, #tpu.memory_space<vmem>>, vector<8x128xf32>
    tpu.vector_store %arg7[%c0_13, %c0_14], %21 {strides = array<i32>} : memref<8x128xf32, #tpu.memory_space<vmem>>, vector<8x128xf32>,
    %c0_i32_15 = arith.constant 0 : i32
    %23 = arith.cmpi eq, %arg2, %c0_i32_15 : i32
    %24 = arith.extui %23 : i1 to i32
    %c0_i32_16 = arith.constant 0 : i32
    %25 = arith.cmpi ne, %24, %c0_i32_16 : i32
    scf.if %25 {
      %c0_17 = arith.constant 0 : index
      %c0_18 = arith.constant 0 : index
      %26 = vector.load %arg7[%c0_17, %c0_18] : memref<8x128xf32, #tpu.memory_space<vmem>>, vector<8x128xf32>
      %c0_19 = arith.constant 0 : index
      %c0_20 = arith.constant 0 : index
      %c0_21 = arith.constant 0 : index
      %27 = vector.load %arg6[%c0_19, %c0_20, %c0_21] : memref<1x8x128xf32, #tpu.memory_space<vmem>>, vector<1x8x128xf32>
      %28 = vector.shape_cast %27 : vector<1x8x128xf32> to vector<8x128xf32>
      %29 = vector.shape_cast %26 : vector<8x128xf32> to vector<1x8x128xf32>
      tpu.vector_store %arg6[%c0_19, %c0_20, %c0_21], %29 {strides = array<i32>} : memref<1x8x128xf32, #tpu.memory_space<vmem>>, vector<1x8x128xf32>,
    } else {
    }
    return
  }
  func.func @transform_0(%arg0: i32, %arg1: i32, %arg2: i32) -> (i32, i32) {
    %c1_i32 = arith.constant 1 : i32
    %0 = arith.muli %arg0, %c1_i32 : i32
    %1 = arith.addi %0, %arg2 : i32
    %c0_i32 = arith.constant 0 : i32
    %2 = arith.minsi %1, %c0_i32 : i32
    %c0_i32_0 = arith.constant 0 : i32
    return %arg1, %2 : i32, i32
  }
  func.func @transform_1(%arg0: i32, %arg1: i32, %arg2: i32) -> (i32, i32) {
    %c1_i32 = arith.constant 1 : i32
    %0 = arith.muli %arg0, %c1_i32 : i32
    %1 = arith.addi %0, %arg2 : i32
    %c0_i32 = arith.constant 0 : i32
    %2 = arith.minsi %1, %c0_i32 : i32
    %c0_i32_0 = arith.constant 0 : i32
    return %arg1, %2 : i32, i32
  }
  func.func @transform_2(%arg0: i32, %arg1: i32, %arg2: i32) -> (i32, i32) {
    %c1_i32 = arith.constant 1 : i32
    %0 = arith.muli %arg0, %c1_i32 : i32
    %1 = arith.addi %0, %arg2 : i32
    %c0_i32 = arith.constant 0 : i32
    %c0_i32_0 = arith.constant 0 : i32
    return %c0_i32, %1 : i32, i32
  }
  func.func @transform_3(%arg0: i32, %arg1: i32, %arg2: i32) -> (i32, i32, i32) {
    %c0_i32 = arith.constant 0 : i32
    %c0_i32_0 = arith.constant 0 : i32
    return %arg0, %arg1, %c0_i32 : i32, i32, i32
  }
}

</mosaic_0001>

<bundles_post_ra>
// kernel: tloss_forward.1
= control target key start
LH: loop header
LB: loop body
LE: loop exit
PB: predicated region body
PF: predicated region fallthrough
CT: control target
= control target key end

     0   :  { %v128_v3 = vlaneseq  ;;  %v291_v14 = vmov 1983009808   ;;  %s369_s0 = inlined_call_operand.vmem [shape: f32[2,256], index: 0, kind: input, shape index: {}]   ;;  %s370_s1 = inlined_call_operand.vmem [shape: f32[2,256], index: 1, kind: input, shape index: {}]   ;;  %s371_s2 = inlined_call_operand.vmem [shape: f32[1,256], index: 2, kind: input, shape index: {}]   ;;  %s372_s3 = inlined_call_operand.vmem [shape: f32[1,2,128], index: 3, kind: output, shape index: {}]  }
   0x1   :  { %v102_v0 = vld [vmem:[%s369_s0] sm:$0x3]  ;;  %v103_v1 = vld [vmem:[%s369_s0 + $0x4] sm:$0x3]  ;;  %v104_v2 = vld [vmem:[%s369_s0 + $0x8] sm:$0x3]  ;;  %v126_v15 = vunpack.c.l.s4 %v291_v14 }
   0x2   :  { %v105_v4 = vld [vmem:[%s369_s0 + $0xc] sm:$0x3]  ;;  %v106_v5 = vld [vmem:[%s370_s1] sm:$0x3]  ;;  %v107_v6 = vld [vmem:[%s370_s1 + $0x4] sm:$0x3] }
   0x3   :  { %v108_v7 = vld [vmem:[%s370_s1 + $0x8] sm:$0x3]  ;;  %v109_v8 = vld [vmem:[%s370_s1 + $0xc] sm:$0x3]  ;;  %v288_v9 = vld [vmem:[%s371_s2] ss:$0 sm:$0xff]  ;;  %v110_v12 = vsub.f32 %v102_v0, %v106_v5  ;;  %v111_v19 = vsub.f32 %v103_v1, %v107_v6  ;;  %v127_v25 = vunpack.c.0.s8 %v126_v15 }
   0x4   :  { %v153_v10 = vld [vmem:[%s369_s0 + $0x2] sm:$0x3]  ;;  %v154_v11 = vld [vmem:[%s369_s0 + $0x6] sm:$0x3]  ;;  %v112_v13 = vsub.f32 %v104_v2, %v108_v7  ;;  %v129_v16 = vshrl.u32 %v128_v3, 7  ;;  %v113_v20 = vsub.f32 %v105_v4, %v109_v8  ;;  %v124_v24 = vcombine.high %v288_v9, %v288_v9 }
   0x5   :  { %v155_v17 = vld [vmem:[%s369_s0 + $0xa] sm:$0x3]  ;;  %v156_v18 = vld [vmem:[%s369_s0 + $0xe] sm:$0x3]  ;;  %v157_v21 = vld [vmem:[%s370_s1 + $0x2] sm:$0x3]  ;;  %v114_v33 = vmul.f32 %v110_v12, %v110_v12  ;;  %v115_v36 = vmul.f32 %v111_v19, %v111_v19 }
   0x6   :  { %v158_v22 = vld [vmem:[%s370_s1 + $0x6] sm:$0x3]  ;;  %v159_v23 = vld [vmem:[%s370_s1 + $0xa] sm:$0x3]  ;;  %v160_v26 = vld [vmem:[%s370_s1 + $0xe] sm:$0x3]  ;;  %v161_v27 = vsub.f32 %v153_v10, %v157_v21  ;;  %v116_v34 = vmul.f32 %v112_v13, %v112_v13  ;;  %v130_v35 = vsub.s32 %v127_v25, %v129_v16  ;;  %v117_v37 = vmul.f32 %v113_v20, %v113_v20 }
   0x7   :  { %v163_v28 = vsub.f32 %v155_v17, %v159_v23  ;;  %v289_v29 = vld [vmem:[%s371_s2 + $0x1] ss:$0 sm:$0xff]  ;;  %v162_v30 = vsub.f32 %v154_v11, %v158_v22  ;;  %v164_v31 = vsub.f32 %v156_v18, %v160_v26 }
   0x8   :  { %v175_v32 = vcombine.high %v289_v29, %v289_v29  ;;  %v165_v38 = vmul.f32 %v161_v27, %v161_v27  ;;  %v131_v40 = vrot.slane %v288_v9, %v130_v35  ;;  %v138_v41 = vrot.slane %v124_v24, %v130_v35 }
   0x9   :  { %v167_v39 = vmul.f32 %v163_v28, %v163_v28  ;;  %v182_v42 = vrot.slane %v289_v29, %v130_v35  ;;  %v166_v44 = vmul.f32 %v162_v30, %v162_v30  ;;  %v168_v45 = vmul.f32 %v164_v31, %v164_v31 }
   0xa   :  { %v189_v43 = vrot.slane %v175_v32, %v130_v35  ;;  %v139_v46 = vcombine.high %v131_v40, %v131_v40  ;;  %v140_v47 = vcombine.high %v138_v41, %v138_v41  ;;  %v145_v48 = vmul.f32 %v131_v40, %v114_v33 }
   0xb   :  { %v147_v49 = vmul.f32 %v138_v41, %v116_v34  ;;  %v190_v50 = vcombine.high %v182_v42, %v182_v42  ;;  %v196_v52 = vmul.f32 %v182_v42, %v165_v38 }
   0xc   :  { %v191_v51 = vcombine.high %v189_v43, %v189_v43  ;;  %v198_v53 = vmul.f32 %v189_v43, %v167_v39  ;;  %v146_v54 = vmul.f32 %v139_v46, %v115_v36  ;;  %v148_v55 = vmul.f32 %v140_v47, %v117_v37 }
   0xd   :  { %v197_v56 = vmul.f32 %v190_v50, %v166_v44  ;;  %v200_v58 = vadd.f32 %v196_v52, %v145_v48 }
   0xe   :  { %v199_v57 = vmul.f32 %v191_v51, %v168_v45  ;;  %v202_v59 = vadd.f32 %v198_v53, %v147_v49 }
   0xf   :  { %v201_v60 = vadd.f32 %v197_v56, %v146_v54 }
  0x10   :  { %v203_v61 = vadd.f32 %v199_v57, %v148_v55 }
  0x11   :  { %v209_v62 = vcombine.low %v200_v58, %v201_v60 }
  0x12   :  { %v210_v63 = vcombine.low %v202_v59, %v203_v61 }
  0x13   :  { %v217_v0 = vrot.slane %v209_v62, %v130_v35 }
  0x14   :  { %v224_v1 = vrot.slane %v210_v63, %v130_v35 }
  0x16   :  { %v225_v2 = vcombine.low %v217_v0, %v224_v1 }
  0x18   :  { %233 = vst [vmem:[#allocation3] sm:$0xff] %v225_v2 }
  0x1f   :  { %v251_v3 = vld [vmem:[#allocation3] sm:$0x3] }
  0x20   :  { %252 = vst [vmem:[%s372_s3] sm:$0x3] %v251_v3 }

</bundles_post_ra>
